<compile_context>
chip_gen: v7x
topology: tpu7x:2x2x1
jax: 0.10.0
libtpu: 0.0.40
codegen_flags: <defaults>
</compile_context>

<pallas_src>
import jax
import jax.numpy as jnp
from jax.experimental import pallas as pl
from jax.experimental.pallas import tpu as pltpu


_LANE = 128
_TILE_BYTES = 6 * 1024 * 1024        # ~6 MiB row tiles (perf review: v7x sweet spot)
_VMEM_LIMIT_BYTES = 48 * 1024 * 1024  # < 64 MiB physical on v7x; plenty on v5e/v6e


# --------------------------------------------------------------------------- #
# Kernels
# --------------------------------------------------------------------------- #
def _identity_kernel(x_ref, o_ref):
    # Straight VMEM tile copy (the "forward" of Identity).
    o_ref[...] = x_ref[...]


def _dma_identity_kernel(x_hbm, o_hbm, sem):
    # Flat HBM->HBM DMA: no VMEM staging, no (8,128) layout constraints.
    cp = pltpu.make_async_copy(x_hbm, o_hbm, sem)
    cp.start()
    cp.wait()


# --------------------------------------------------------------------------- #
# Tiling helpers
# --------------------------------------------------------------------------- #
def _sublane_multiple(dtype) -> int:
    # 8 for 32-bit, 16 for bf16/f16, 32 for int8/fp8 (packed sublanes).
    # TODO(synk): sub-byte dtypes (int4/fp4) report itemsize 1 here; verify
    # packing before routing 4-bit data through the tiled path.
    itemsize = jnp.dtype(dtype).itemsize
    return max(8, 32 // itemsize)


def _tile_rows_for(rows: int, cols: int, dtype) -> int:
    """Pick a row-tile height: ~_TILE_BYTES per tile, but never fewer than
    2 (ideally 4+) grid steps when the slab is splittable, so both v7x
    TensorCores issue DMAs."""
    sub = _sublane_multiple(dtype)
    itemsize = jnp.dtype(dtype).itemsize

    if rows <= 2 * sub:
        # Tiny slab: single block whose row dim equals the full array dim
        # (allowed even if not a multiple of the sublane count).
        return rows

    # Bytes-target tile height, rounded down to a sublane multiple.
    tr = max(sub, (_TILE_BYTES // (cols * itemsize)) // sub * sub)

    # Cap so the grid has >=2 steps (>=4 for larger slabs) -> megacore work.
    min_blocks = 4 if rows >= 8 * sub else 2
    cap = pl.cdiv(pl.cdiv(rows, min_blocks), sub) * sub
    return min(tr, cap)


# --------------------------------------------------------------------------- #
# pallas_call wrappers
# --------------------------------------------------------------------------- #
def _copy_2d(x2d: jax.Array, tile_rows: int, donate_input: bool) -> jax.Array:
    """Tiled, lane-dense, double-buffered VMEM copy of a (rows, cols) slab.
    A partial last row block (rows % tile_rows != 0) is masked by Pallas."""
    rows, cols = x2d.shape
    itemsize = jnp.dtype(x2d.dtype).itemsize
    kwargs = {}
    if donate_input:
        # Safe only because in/out index_maps are identical (in-place self-copy).
        kwargs["input_output_aliases"] = {0: 0}
    return pl.pallas_call(
        _identity_kernel,
        out_shape=jax.ShapeDtypeStruct((rows, cols), x2d.dtype),
        grid_spec=pltpu.PrefetchScalarGridSpec(
            num_scalar_prefetch=0,
            grid=(pl.cdiv(rows, tile_rows),),
            in_specs=[pl.BlockSpec((tile_rows, cols), lambda i: (i, 0))],
            out_specs=pl.BlockSpec((tile_rows, cols), lambda i: (i, 0)),
        ),
        compiler_params=pltpu.CompilerParams(
            # Independent row tiles -> shard across v7x's 2 TensorCores.
            dimension_semantics=("parallel",),
            vmem_limit_bytes=_VMEM_LIMIT_BYTES,
        ),
        cost_estimate=pl.CostEstimate(
            flops=0,
            transcendentals=0,
            bytes_accessed=2 * rows * cols * itemsize,
        ),
        **kwargs,
    )(x2d)


def _copy_flat_dma(x_flat: jax.Array) -> jax.Array:
    """Ragged fallback: one flat HBM->HBM DMA (exactly 1x read + 1x write)."""
    n = x_flat.shape[0]
    itemsize = jnp.dtype(x_flat.dtype).itemsize
    return pl.pallas_call(
        _dma_identity_kernel,
        out_shape=jax.ShapeDtypeStruct((n,), x_flat.dtype),
        in_specs=[pl.BlockSpec(memory_space=pl.ANY)],
        out_specs=pl.BlockSpec(memory_space=pl.ANY),
        scratch_shapes=[pltpu.SemaphoreType.DMA],
        cost_estimate=pl.CostEstimate(
            flops=0, transcendentals=0, bytes_accessed=2 * n * itemsize
        ),
    )(x_flat)


# --------------------------------------------------------------------------- #
# Public entry point
# --------------------------------------------------------------------------- #
def identity(x: jax.Array, *, donate_input: bool = False) -> jax.Array:
    """Pallas implementation of Identity.forward(x) == x.

    Set donate_input=True ONLY when the caller actually donates `x`; otherwise
    XLA inserts a defensive copy in front of the kernel (2x HBM traffic).
    """
    orig_shape = x.shape
    n = x.size
    if n == 0:
        return x

    flat = x.reshape(-1)

    # Lane-dense fast path: pick the widest column count (multiple of 128) that
    # divides n exactly. Rows need not be sublane aligned -- the partial last
    # row block is masked by Pallas -- so this covers nearly all shapes.
    cols = 0
    for c in (4096, 2048, 1024, 512, 256, 128):
        if n % c == 0:
            cols = c
            break

    if cols:
        rows = n // cols
        x2d = flat.reshape(rows, cols)
        out2d = _copy_2d(x2d, _tile_rows_for(rows, cols, x.dtype), donate_input)
        return out2d.reshape(orig_shape)

    # Truly ragged (n % 128 != 0): flat HBM->HBM DMA, no padding, no layout rules.
    return _copy_flat_dma(flat).reshape(orig_shape)


if __name__ == "__main__":
    key = jax.random.PRNGKey(0)
    x = jax.random.normal(key, (2, 4, 16, 16), dtype=jnp.float32)  # NCHW

    y = identity(x)
    jax.block_until_ready(y)

    assert y.shape == x.shape and y.dtype == x.dtype
    assert bool(jnp.all(y == x))
    print("KERNEL_OK")
</pallas_src>

<mosaic_0001>
module attributes {stable_mosaic.version = 11 : i64} {
  func.func @_identity_kernel(%arg0: i32, %arg1: memref<1x2048xf32, #tpu.memory_space<vmem>>, %arg2: memref<1x2048xf32, #tpu.memory_space<vmem>>) attributes {dimension_semantics = [#tpu.dimension_semantics<parallel>], iteration_bounds = array<i64: 1>, scalar_prefetch = 0 : i64, scratch_operands = 0 : i64, tpu.core_type = #tpu.core_type<tc>, window_params = [{transform_indices = @transform_0, window_bounds = array<i64: 1, 2048>}, {transform_indices = @transform_1, window_bounds = array<i64: 1, 2048>}]} {
    %c0 = arith.constant 0 : index
    %c0_0 = arith.constant 0 : index
    %0 = vector.load %arg1[%c0, %c0_0] : memref<1x2048xf32, #tpu.memory_space<vmem>>, vector<1x2048xf32>
    %c0_1 = arith.constant 0 : index
    %c0_2 = arith.constant 0 : index
    %1 = vector.load %arg2[%c0_1, %c0_2] : memref<1x2048xf32, #tpu.memory_space<vmem>>, vector<1x2048xf32>
    tpu.vector_store %arg2[%c0_1, %c0_2], %0 {strides = array<i32>} : memref<1x2048xf32, #tpu.memory_space<vmem>>, vector<1x2048xf32>,
    return
  }
  func.func @transform_0(%arg0: i32) -> (i32, i32) {
    %c0_i32 = arith.constant 0 : i32
    %c0_i32_0 = arith.constant 0 : i32
    return %arg0, %c0_i32 : i32, i32
  }
  func.func @transform_1(%arg0: i32) -> (i32, i32) {
    %c0_i32 = arith.constant 0 : i32
    %c0_i32_0 = arith.constant 0 : i32
    return %arg0, %c0_i32 : i32, i32
  }
}

</mosaic_0001>

<bundles_post_ra>
// kernel: tpu_custom_call.1
= control target key start
LH: loop header
LB: loop body
LE: loop exit
PB: predicated region body
PF: predicated region fallthrough
CT: control target
= control target key end

     0   :  { %6 = vsyncpa [#allocation3], 0  ;;  %s126_s0 = inlined_call_operand.hbm [shape: f32[1,2048], index: 0, kind: input, shape index: {}]   ;;  %s127_s1 = inlined_call_operand.hbm [shape: f32[1,2048], index: 1, kind: output, shape index: {}]  }
   0x1   :  { %7 = vsyncpa [#allocation4], 0  ;;  %s90_s6 = smov [#allocation2]   ;;  %s42_s10 = scalar_lea.hbm %s126_s0, 256 }
   0x2   :  { %s14_s7 = sshll.u32 %s90_s6, 4  ;;  %p43_p0 = scmp.ne.s32.totalorder %s126_s0, %s42_s10  ;;  %s15_s7 = int_to_ptr.vmem [resolvable:$true] %s14_s7 }
   0x3   :  { %p46_p1 = scmp.lt.u32.totalorder %s42_s10, %s126_s0 }
   0x5   :  { %p48_p2 = pnand %p46_p1, %p43_p0 }
   0x7   :  { %51 = shalt.err (!%p48_p2)
}
   0x8   :  { %s52_s15 = scalar_lea.vmem %s15_s7, 256  ;;  %p57_p4 = scmp.lt.s32.totalorder %s15_s7, %s15_s7 }
   0x9   :  { %p53_p3 = scmp.ne.s32.totalorder %s15_s7, %s52_s15  ;;  %p58_p5 = scmp.lt.s32.totalorder %s52_s15, %s52_s15 }
   0xb   :  { %p59_p6 = por %p58_p5, %p57_p4 }
   0xd   :  { %p60_p7 = pnand %p59_p6, %p53_p3 }
   0xf   :  { %63 = shalt.err (!%p60_p7)
}
  0x10   :  { %17 = dma.hbm_to_vmem [thread:$0]  %s126_s0, 256, %s15_s7, [#allocation3]  }
  0x11   :  { %86 = dma.done.wait [#allocation3], 256  }
  0x12   :  { %87 = vsyncadd [#allocation3], 4294967040  ;;  %s91_s18 = smov [#allocation5]   ;;  %v21_v0 = vld [vmem:[#allocation2] sm:$0xff]  ;;  %v22_v1 = vld [vmem:[#allocation2 + $0x8] sm:$0xff] }
  0x13   :  { %s31_s19 = sshll.u32 %s91_s18, 4  ;;  %23 = vst [vmem:[#allocation5] sm:$0xff] %v21_v0  ;;  %24 = vst [vmem:[#allocation5 + $0x8] sm:$0xff] %v22_v1  ;;  %s32_s19 = int_to_ptr.vmem [resolvable:$true] %s31_s19 }
  0x14   :  { %s64_s20 = scalar_lea.vmem %s32_s19, 256  ;;  %p69_p9 = scmp.lt.s32.totalorder %s32_s19, %s32_s19 }
  0x15   :  { %p65_p8 = scmp.ne.s32.totalorder %s32_s19, %s64_s20  ;;  %p70_p10 = scmp.lt.s32.totalorder %s64_s20, %s64_s20 }
  0x17   :  { %p71_p11 = por %p70_p10, %p69_p9 }
  0x19   :  { %p72_p12 = pnand %p71_p11, %p65_p8 }
  0x1b   :  { %75 = shalt.err (!%p72_p12)
}
  0x1c   :  { %s76_s0 = scalar_lea.hbm %s127_s1, 256 }
  0x1d   :  { %p77_p13 = scmp.ne.s32.totalorder %s127_s1, %s76_s0  ;;  %p80_p0 = scmp.lt.u32.totalorder %s76_s0, %s127_s1 }
  0x1f   :  { %p82_p1 = pnand %p80_p0, %p77_p13 }
  0x21   :  { %85 = shalt.err (!%p82_p1)
}
  0x22   :  { %34 = dma.vmem_to_hbm [thread:$0]  %s32_s19, 256, %s127_s1, [#allocation4]  }
  0x23   :  { %88 = dma.done.wait [#allocation4], 256  }
  0x24   :  { %89 = vsyncadd [#allocation4], 4294967040 }
  0x25   :  { %38 = vsyncpa [#allocation3], 1 }
  0x26   :  { %39 = vsyncpa [#allocation4], 1 }

</bundles_post_ra>
